<compile_context>
chip_gen: v7x
topology: tpu7x:2x2x1
jax: 0.10.0
libtpu: 0.0.40
codegen_flags: <defaults>
</compile_context>

<pallas_src>
import functools

import jax
import jax.numpy as jnp
from jax.experimental import pallas as pl
from jax.experimental.pallas import tpu as pltpu


def _dw3x3_kernel(x_ref, w_ref, b_ref, s_ref, o_ref, *, shift_n, H, W):
    # x_ref : (1, cblk, H*W) int8    activation block (one image, cblk channels)
    # w_ref : (cblk, 9)      f32     depthwise taps, k = ky*3 + kx
    # b_ref : (cblk, 1)      f32     per-channel bias
    # s_ref : (cblk, 1)      f32     per-channel scale
    # o_ref : (1, cblk, H*W) int8    output block
    HW = H * W
    x = x_ref[0].astype(jnp.float32)                      # (cblk, HW)
    cblk = x.shape[0]

    def roll(v, s):                                        # np.roll semantics, lane axis
        return pltpu.roll(v, s % HW, axis=1)

    # Boundary masks from the flattened coordinate p = h*W + w (built once).
    idx = jax.lax.broadcasted_iota(jnp.int32, (cblk, HW), 1)
    col = (idx & (W - 1)) if (W & (W - 1)) == 0 else (idx % W)
    has_left = col > 0
    has_right = col < (W - 1)
    not_top = idx >= W
    not_bot = idx < (H - 1) * W

    # Horizontal neighbours via XLU rolls + single-column masks (no halo scratch).
    xl = jnp.where(has_left, roll(x, 1), 0.0)              # x[h, w-1]
    xr = jnp.where(has_right, roll(x, -1), 0.0)            # x[h, w+1]

    w_blk = w_ref[...]                                     # (cblk, 9)

    def wcol(k):                                           # per-channel tap weight
        return w_blk[:, k:k + 1]                           # (cblk, 1)

    def trow(ky):                                          # weighted sum of one source row
        return xl * wcol(3 * ky) + x * wcol(3 * ky + 1) + xr * wcol(3 * ky + 2)

    acc = b_ref[...] + trow(1)                                           # dy =  0 (+ bias)
    acc = acc + jnp.where(not_top, roll(trow(0), W), 0.0)                # dy = -1
    acc = acc + jnp.where(not_bot, roll(trow(2), -W), 0.0)               # dy = +1

    # Requant epilogue (float32 path, identical to the torch module's math).
    mul = acc * s_ref[...] + float(2 ** (shift_n - 1))
    q = mul.astype(jnp.int32)                              # trunc toward zero
    shifted = jnp.right_shift(q, shift_n)                  # arithmetic >> shift_n
    o_ref[0] = jnp.clip(shifted, 0, 127).astype(jnp.int8)  # fused clamp + relu, int8 out


def _pick_cblk(N, C, HW):
    """Largest channel block that (a) divides C, (b) obeys the (8,128) block rule,
    (c) keeps the per-step VMEM footprint ~<20 MiB (safe on v7x), (d) leaves >=2
    grid steps so both TensorCores get work."""
    bytes_per_chan = HW * (2 * 1 + 2 * 1 + 8 * 4)   # 2x int8 in + 2x int8 out + f32 temps
    budget = 20 * 1024 * 1024
    max_cblk = max(1, budget // bytes_per_chan)
    divisors = [d for d in range(1, C + 1) if C % d == 0]
    valid = [d for d in divisors if d <= max_cblk and (d % 8 == 0 or d == C)]
    if not valid:
        return C  # TODO(synk): needs H tiling for this to fit VMEM on huge images
    cblk = max(valid)
    if N * (C // cblk) < 2:
        smaller = [d for d in valid if d < cblk]
        if smaller:
            cblk = max(smaller)
    return cblk


def tb_module_3x3_dw_forward(x_nchw, int_weight, int_bias, int_scale, shift_n=8):
    """x_nchw: (N, C, H, W) int8 activations (int8 required — fuse any quantize
    cast into the producing kernel). int_weight: (9, C); int_bias/int_scale: (C,).
    Returns (N, C, H, W) int8 (post-relu values are exactly representable)."""
    if x_nchw.dtype != jnp.int8:
        raise TypeError("tb_module_3x3_dw_forward requires int8 activations; "
                        "casting f32->int8 here would add a full HBM pass.")
    N, C, H, W = x_nchw.shape
    HW = H * W

    x_flat = x_nchw.reshape(N, C, HW)                      # free reshape (contiguous)
    w_t = jnp.asarray(int_weight, jnp.float32).T           # (C, 9)
    b = jnp.asarray(int_bias, jnp.float32).reshape(C, 1)
    s = jnp.asarray(int_scale, jnp.float32).reshape(C, 1)

    cblk = _pick_cblk(N, C, HW)
    kernel = functools.partial(_dw3x3_kernel, shift_n=shift_n, H=H, W=W)

    out = pl.pallas_call(
        kernel,
        out_shape=jax.ShapeDtypeStruct((N, C, HW), jnp.int8),
        grid=(N, C // cblk),
        in_specs=[
            pl.BlockSpec((1, cblk, HW), lambda n, c: (n, c, 0)),   # activations (int8)
            pl.BlockSpec((cblk, 9), lambda n, c: (c, 0)),          # taps
            pl.BlockSpec((cblk, 1), lambda n, c: (c, 0)),          # bias
            pl.BlockSpec((cblk, 1), lambda n, c: (c, 0)),          # scale
        ],
        out_specs=pl.BlockSpec((1, cblk, HW), lambda n, c: (n, c, 0)),
        compiler_params=pltpu.CompilerParams(
            dimension_semantics=("parallel", "parallel"),
            vmem_limit_bytes=32 * 1024 * 1024),
    )(x_flat, w_t, b, s)

    return out.reshape(N, C, H, W)                         # int8, values in [0, 127]


def _reference(x_nchw_f32, int_weight, int_bias, int_scale, shift_n=8):
    """Pure-JAX reference with identical semantics (for verification)."""
    N, C, H, W = x_nchw_f32.shape
    x = jnp.transpose(x_nchw_f32, (0, 2, 3, 1)).astype(jnp.float32)
    xp = jnp.pad(x, ((0, 0), (1, 1), (1, 1), (0, 0)))
    acc = jnp.zeros((N, H, W, C), jnp.float32)
    for ky in range(3):
        for kx in range(3):
            acc = acc + xp[:, ky:ky + H, kx:kx + W, :] * int_weight[ky * 3 + kx].astype(jnp.float32)
    mul = (acc + int_bias.astype(jnp.float32)) * int_scale.astype(jnp.float32) + 2.0 ** (shift_n - 1)
    q = jnp.right_shift(mul.astype(jnp.int32), shift_n).astype(jnp.float32)
    out = jnp.maximum(jnp.clip(q, -128.0, 127.0), 0.0)
    return jnp.transpose(out, (0, 3, 1, 2))


if __name__ == "__main__":
    key = jax.random.PRNGKey(0)
    k_x, k_w, k_b, k_s = jax.random.split(key, 4)

    N, C, H, W = 2, 8, 16, 16
    shift_n = 8

    # deterministic synthetic integer parameters (shapes per module __init__)
    int_weight = jax.random.randint(k_w, (9, C), -128, 128).astype(jnp.float32)
    int_bias = jax.random.randint(k_b, (C,), -512, 512).astype(jnp.float32)
    int_scale = jax.random.randint(k_s, (C,), 1, 32).astype(jnp.float32)

    # int8 activations (quantized features from the previous layer)
    x_i8 = jax.random.randint(k_x, (N, C, H, W), -128, 128).astype(jnp.int8)

    out = tb_module_3x3_dw_forward(x_i8, int_weight, int_bias, int_scale, shift_n)
    out = jax.block_until_ready(out)

    ref = _reference(x_i8.astype(jnp.float32), int_weight, int_bias, int_scale, shift_n)
    assert out.shape == (N, C, H, W) and out.dtype == jnp.int8
    assert jnp.array_equal(out.astype(jnp.float32), ref), "mismatch vs reference"
    print("KERNEL_OK")
</pallas_src>

<mosaic_0001>
module attributes {stable_mosaic.version = 11 : i64} {
  func.func @_dw3x3_kernel(%arg0: i32, %arg1: i32, %arg2: memref<1x8x256xi8, #tpu.memory_space<vmem>>, %arg3: memref<8x9xf32, #tpu.memory_space<vmem>>, %arg4: memref<8x1xf32, #tpu.memory_space<vmem>>, %arg5: memref<8x1xf32, #tpu.memory_space<vmem>>, %arg6: memref<1x8x256xi8, #tpu.memory_space<vmem>>) attributes {dimension_semantics = [#tpu.dimension_semantics<parallel>, #tpu.dimension_semantics<parallel>], iteration_bounds = array<i64: 2, 1>, scalar_prefetch = 0 : i64, scratch_operands = 0 : i64, tpu.core_type = #tpu.core_type<tc>, window_params = [{transform_indices = @transform_0, window_bounds = array<i64: 1, 8, 256>}, {transform_indices = @transform_1, window_bounds = array<i64: 8, 9>}, {transform_indices = @transform_2, window_bounds = array<i64: 8, 1>}, {transform_indices = @transform_3, window_bounds = array<i64: 8, 1>}, {transform_indices = @transform_4, window_bounds = array<i64: 1, 8, 256>}]} {
    %c0 = arith.constant 0 : index
    %c0_0 = arith.constant 0 : index
    %c0_1 = arith.constant 0 : index
    %0 = vector.load %arg2[%c0, %c0_0, %c0_1] : memref<1x8x256xi8, #tpu.memory_space<vmem>>, vector<1x8x256xi8>
    %1 = vector.shape_cast %0 : vector<1x8x256xi8> to vector<8x256xi8>
    %2 = arith.sitofp %1 : vector<8x256xi8> to vector<8x256xf32>
    %3 = tpu.iota {dimensions = array<i32: 1>} : vector<8x256xi32>
    %c15_i32 = arith.constant 15 : i32
    %4 = vector.broadcast %c15_i32 : i32 to vector<8x256xi32>
    %5 = arith.andi %3, %4 : vector<8x256xi32>
    %c0_i32 = arith.constant 0 : i32
    %6 = vector.broadcast %c0_i32 : i32 to vector<8x256xi32>
    %7 = arith.cmpi sgt, %5, %6 : vector<8x256xi32>
    %c15_i32_2 = arith.constant 15 : i32
    %8 = vector.broadcast %c15_i32_2 : i32 to vector<8x256xi32>
    %9 = arith.cmpi slt, %5, %8 : vector<8x256xi32>
    %c16_i32 = arith.constant 16 : i32
    %10 = vector.broadcast %c16_i32 : i32 to vector<8x256xi32>
    %11 = arith.cmpi sge, %3, %10 : vector<8x256xi32>
    %c240_i32 = arith.constant 240 : i32
    %12 = vector.broadcast %c240_i32 : i32 to vector<8x256xi32>
    %13 = arith.cmpi slt, %3, %12 : vector<8x256xi32>
    %c1_i32 = arith.constant 1 : i32
    %14 = tpu.dynamic_rotate %2 by %c1_i32 dim 1 : vector<8x256xf32>, i32 -> vector<8x256xf32>
    %cst = arith.constant 0.000000e+00 : f32
    %15 = vector.broadcast %cst : f32 to vector<8x256xf32>
    %16 = arith.select %7, %14, %15 : vector<8x256xi1>, vector<8x256xf32>
    %c255_i32 = arith.constant 255 : i32
    %17 = tpu.dynamic_rotate %2 by %c255_i32 dim 1 : vector<8x256xf32>, i32 -> vector<8x256xf32>
    %cst_3 = arith.constant 0.000000e+00 : f32
    %18 = vector.broadcast %cst_3 : f32 to vector<8x256xf32>
    %19 = arith.select %9, %17, %18 : vector<8x256xi1>, vector<8x256xf32>
    %c0_4 = arith.constant 0 : index
    %c0_5 = arith.constant 0 : index
    %20 = vector.load %arg3[%c0_4, %c0_5] : memref<8x9xf32, #tpu.memory_space<vmem>>, vector<8x9xf32>
    %c0_6 = arith.constant 0 : index
    %c0_7 = arith.constant 0 : index
    %21 = vector.load %arg4[%c0_6, %c0_7] : memref<8x1xf32, #tpu.memory_space<vmem>>, vector<8x1xf32>
    %22 = vector.extract_strided_slice %20 {offsets = [0, 3], sizes = [8, 1], strides = [1, 1]} : vector<8x9xf32> to vector<8x1xf32>
    %23 = vector.broadcast %22 : vector<8x1xf32> to vector<8x256xf32>
    %24 = arith.mulf %16, %23 : vector<8x256xf32>
    %25 = vector.extract_strided_slice %20 {offsets = [0, 4], sizes = [8, 1], strides = [1, 1]} : vector<8x9xf32> to vector<8x1xf32>
    %26 = vector.broadcast %25 : vector<8x1xf32> to vector<8x256xf32>
    %27 = arith.mulf %2, %26 : vector<8x256xf32>
    %28 = arith.addf %24, %27 : vector<8x256xf32>
    %29 = vector.extract_strided_slice %20 {offsets = [0, 5], sizes = [8, 1], strides = [1, 1]} : vector<8x9xf32> to vector<8x1xf32>
    %30 = vector.broadcast %29 : vector<8x1xf32> to vector<8x256xf32>
    %31 = arith.mulf %19, %30 : vector<8x256xf32>
    %32 = arith.addf %28, %31 : vector<8x256xf32>
    %33 = vector.broadcast %21 : vector<8x1xf32> to vector<8x256xf32>
    %34 = arith.addf %33, %32 : vector<8x256xf32>
    %35 = vector.extract_strided_slice %20 {offsets = [0, 0], sizes = [8, 1], strides = [1, 1]} : vector<8x9xf32> to vector<8x1xf32>
    %36 = vector.broadcast %35 : vector<8x1xf32> to vector<8x256xf32>
    %37 = arith.mulf %16, %36 : vector<8x256xf32>
    %38 = vector.extract_strided_slice %20 {offsets = [0, 1], sizes = [8, 1], strides = [1, 1]} : vector<8x9xf32> to vector<8x1xf32>
    %39 = vector.broadcast %38 : vector<8x1xf32> to vector<8x256xf32>
    %40 = arith.mulf %2, %39 : vector<8x256xf32>
    %41 = arith.addf %37, %40 : vector<8x256xf32>
    %42 = vector.extract_strided_slice %20 {offsets = [0, 2], sizes = [8, 1], strides = [1, 1]} : vector<8x9xf32> to vector<8x1xf32>
    %43 = vector.broadcast %42 : vector<8x1xf32> to vector<8x256xf32>
    %44 = arith.mulf %19, %43 : vector<8x256xf32>
    %45 = arith.addf %41, %44 : vector<8x256xf32>
    %c16_i32_8 = arith.constant 16 : i32
    %46 = tpu.dynamic_rotate %45 by %c16_i32_8 dim 1 : vector<8x256xf32>, i32 -> vector<8x256xf32>
    %cst_9 = arith.constant 0.000000e+00 : f32
    %47 = vector.broadcast %cst_9 : f32 to vector<8x256xf32>
    %48 = arith.select %11, %46, %47 : vector<8x256xi1>, vector<8x256xf32>
    %49 = arith.addf %34, %48 : vector<8x256xf32>
    %50 = vector.extract_strided_slice %20 {offsets = [0, 6], sizes = [8, 1], strides = [1, 1]} : vector<8x9xf32> to vector<8x1xf32>
    %51 = vector.broadcast %50 : vector<8x1xf32> to vector<8x256xf32>
    %52 = arith.mulf %16, %51 : vector<8x256xf32>
    %53 = vector.extract_strided_slice %20 {offsets = [0, 7], sizes = [8, 1], strides = [1, 1]} : vector<8x9xf32> to vector<8x1xf32>
    %54 = vector.broadcast %53 : vector<8x1xf32> to vector<8x256xf32>
    %55 = arith.mulf %2, %54 : vector<8x256xf32>
    %56 = arith.addf %52, %55 : vector<8x256xf32>
    %57 = vector.extract_strided_slice %20 {offsets = [0, 8], sizes = [8, 1], strides = [1, 1]} : vector<8x9xf32> to vector<8x1xf32>
    %58 = vector.broadcast %57 : vector<8x1xf32> to vector<8x256xf32>
    %59 = arith.mulf %19, %58 : vector<8x256xf32>
    %60 = arith.addf %56, %59 : vector<8x256xf32>
    %c240_i32_10 = arith.constant 240 : i32
    %61 = tpu.dynamic_rotate %60 by %c240_i32_10 dim 1 : vector<8x256xf32>, i32 -> vector<8x256xf32>
    %cst_11 = arith.constant 0.000000e+00 : f32
    %62 = vector.broadcast %cst_11 : f32 to vector<8x256xf32>
    %63 = arith.select %13, %61, %62 : vector<8x256xi1>, vector<8x256xf32>
    %64 = arith.addf %49, %63 : vector<8x256xf32>
    %c0_12 = arith.constant 0 : index
    %c0_13 = arith.constant 0 : index
    %65 = vector.load %arg5[%c0_12, %c0_13] : memref<8x1xf32, #tpu.memory_space<vmem>>, vector<8x1xf32>
    %66 = vector.broadcast %65 : vector<8x1xf32> to vector<8x256xf32>
    %67 = arith.mulf %64, %66 : vector<8x256xf32>
    %cst_14 = arith.constant 1.280000e+02 : f32
    %68 = vector.broadcast %cst_14 : f32 to vector<8x256xf32>
    %69 = arith.addf %67, %68 : vector<8x256xf32>
    %70 = arith.fptosi %69 : vector<8x256xf32> to vector<8x256xi32>
    %c8_i32 = arith.constant 8 : i32
    %71 = vector.broadcast %c8_i32 : i32 to vector<8x256xi32>
    %72 = arith.shrsi %70, %71 : vector<8x256xi32>
    %c0_i32_15 = arith.constant 0 : i32
    %c127_i32 = arith.constant 127 : i32
    %73 = vector.broadcast %c0_i32_15 : i32 to vector<8x256xi32>
    %74 = arith.maxsi %73, %72 : vector<8x256xi32>
    %75 = vector.broadcast %c127_i32 : i32 to vector<8x256xi32>
    %76 = arith.minsi %75, %74 : vector<8x256xi32>
    %77 = arith.trunci %76 : vector<8x256xi32> to vector<8x256xi8>
    %c0_16 = arith.constant 0 : index
    %c0_17 = arith.constant 0 : index
    %c0_18 = arith.constant 0 : index
    %78 = vector.load %arg6[%c0_16, %c0_17, %c0_18] : memref<1x8x256xi8, #tpu.memory_space<vmem>>, vector<1x8x256xi8>
    %79 = vector.shape_cast %78 : vector<1x8x256xi8> to vector<8x256xi8>
    %80 = vector.shape_cast %77 : vector<8x256xi8> to vector<1x8x256xi8>
    tpu.vector_store %arg6[%c0_16, %c0_17, %c0_18], %80 {strides = array<i32>} : memref<1x8x256xi8, #tpu.memory_space<vmem>>, vector<1x8x256xi8>,
    return
  }
  func.func @transform_0(%arg0: i32, %arg1: i32) -> (i32, i32, i32) {
    %c0_i32 = arith.constant 0 : i32
    %c0_i32_0 = arith.constant 0 : i32
    return %arg0, %arg1, %c0_i32 : i32, i32, i32
  }
  func.func @transform_1(%arg0: i32, %arg1: i32) -> (i32, i32) {
    %c0_i32 = arith.constant 0 : i32
    %c0_i32_0 = arith.constant 0 : i32
    return %arg1, %c0_i32 : i32, i32
  }
  func.func @transform_2(%arg0: i32, %arg1: i32) -> (i32, i32) {
    %c0_i32 = arith.constant 0 : i32
    %c0_i32_0 = arith.constant 0 : i32
    return %arg1, %c0_i32 : i32, i32
  }
  func.func @transform_3(%arg0: i32, %arg1: i32) -> (i32, i32) {
    %c0_i32 = arith.constant 0 : i32
    %c0_i32_0 = arith.constant 0 : i32
    return %arg1, %c0_i32 : i32, i32
  }
  func.func @transform_4(%arg0: i32, %arg1: i32) -> (i32, i32, i32) {
    %c0_i32 = arith.constant 0 : i32
    %c0_i32_0 = arith.constant 0 : i32
    return %arg0, %arg1, %c0_i32 : i32, i32, i32
  }
}

</mosaic_0001>

<bundles_post_ra>
// kernel: tpu_custom_call.1
= control target key start
LH: loop header
LB: loop body
LE: loop exit
PB: predicated region body
PF: predicated region fallthrough
CT: control target
= control target key end

     0   :  { %9 = vsyncpa [#allocation3], 0  ;;  %s943_s0 = inlined_call_operand.vmem [shape: s8[2,8,256], index: 0, kind: input, shape index: {}]   ;;  %s944_s1 = inlined_call_operand.vmem [shape: f32[8,9], index: 1, kind: input, shape index: {}]   ;;  %s945_s2 = inlined_call_operand.vmem [shape: f32[8,1], index: 2, kind: input, shape index: {}]   ;;  %s946_s3 = inlined_call_operand.vmem [shape: f32[8,1], index: 3, kind: input, shape index: {}]   ;;  %s947_s4 = inlined_call_operand.hbm [shape: s8[2,8,256], index: 4, kind: output, shape index: {}]  }
   0x1   :  { %11 = vsyncpa [#allocation3 + $0x1], 0  ;;  %s795_s15 = smov 0   ;;  %s797_s16 = smov 0  }
   0x2   :  { %s799_s17 = smov 0   ;;  %s801_s18 = smov 0  }
   0x3   :  { %s803_s19 = smov 0   ;;  %s805_s20 = smov 0  }
   0x4 LB: > { %s575_s21 = sadd.s32 4294967295, %s754_s20   ;;  %s576_s22 = sadd.s32 4294967294, %s754_s20   ;;  %s754_s20 = sphi %s805_s20, %s17_s20   ;;  %s750_s19 = sphi %s803_s19, %s954_s19   ;;  %s746_s18 = sphi %s801_s18, %s953_s18   ;;  %s742_s17 = sphi %s799_s17, %s952_s17   ;;  %s738_s16 = sphi %s797_s16, %s951_s16   ;;  %s734_s15 = sphi %s795_s15, %s950_s15  }
   0x5   : > { %s29_s23 = sadd.s32 1, %s750_s19  ;;  %s144_s24 = sadd.s32 1, %s742_s17 }
   0x6   : > { %p31_p0 = scmp.ge.s32.totalorder %s29_s23, 2  ;;  %p154_p1 = scmp.ne.s32.totalorder %s742_s17, %s738_s16 }
   0x7   : > { %p155_p2 = scmp.eq.s32.totalorder %s575_s21, 1  ;;  %p160_p3 = scmp.ne.s32.totalorder %s738_s16, %s734_s15 }
   0x8   : > { %s956_s23 = smov (%p31_p0, %s29_s23), 0  ;;  %p161_p5 = scmp.eq.s32.totalorder %s576_s22, 1 }
   0x9   : > { %p835_p4 = por %p155_p2, %p154_p1  ;;  %s139_s26 = ssub.s32 %s750_s19, %s956_s23 }
   0xa   : > { %p582_p6 = scmp.ge.s32.totalorder %s754_s20, 1  ;;  %p142_p7 = scmp.eq.s32.totalorder %s139_s26, 0 }
   0xb   : > { %p842_p8 = por %p161_p5, %p160_p3  ;;  %p212_p9 = scmp.lt.s32.totalorder %s754_s20, 3 }
   0xc   : > { %s848_s28 = scalar_select %p142_p7, %s742_s17, %s144_s24  }
   0xd   : > { %p213_p10 = pnand %p582_p6, %p212_p9 }
   0xe   : > { %v311_v0 = vld [vmem:[%s944_s1] sm:$0xff] (!%p213_p10)  ;;  %p254_p11 = scmp.lt.s32.totalorder (!%p213_p10), %s746_s18, 1  ;;  %v756_v1 = vmov (!%p213_p10), 2   ;;  %v757_v2 = vmov (!%p213_p10), 0   ;;  %v758_v3 = vmov (!%p213_p10), 6   ;;  %v759_v4 = vmov (!%p213_p10), 1  }
   0xf   : > { %216 = sbr.rel (%p213_p10) target bundleno = 327 (0x147), region = 36  ;;  %667 = vset.pattern.permute.xlu1 (!%p213_p10), %v756_v1  ;;  %665 = vset.pattern.permute.xlu0 (!%p213_p10), %v757_v2  ;;  %v760_v7 = vmov (!%p213_p10), 7   ;;  %v761_v8 = vmov (!%p213_p10), 8   ;;  %s762_s10 = smov (!%p213_p10), 1   ;;  %v764_v12 = vmov (!%p213_p10), 3   ;;  %v765_v13 = vmov (!%p213_p10), 4  }
  0x10   : > { %358 = vperm.xlu1 (!%p213_p10), %667, %v311_v0   ;;  %344 = vperm.xlu0 (!%p213_p10), %665, %v311_v0   ;;  %s763_s11 = smov (!%p213_p10), 127   ;;  %v312_v14 = vld [vmem:[%s945_s2] sm:$0xff] (!%p213_p10)  ;;  %v766_v15 = vmov (!%p213_p10), 5   ;;  %v280_v18 = vlaneseq (!%p213_p10)  ;;  %s767_s22 = smov (!%p213_p10), 16  }
  0x11   : > { %v409_v16 = vld [vmem:[%s946_s3] sm:$0xff] (!%p213_p10)  ;;  %s768_s24 = smov (!%p213_p10), 112   ;;  %s251_s26 = sand.u32 (!%p213_p10), 1, %s738_s16  }
  0x12   : > { %v872_v21 = vand.u32 (!%p213_p10), 127, %v280_v18  ;;  %s583_s29 = sshll.u32 (!%p213_p10), %s251_s26, 2  ;;  %s592_s30 = sshll.u32 (!%p213_p10), %s746_s18, 6 }
  0x14   : > { %668 = vset.pattern.permute.xlu1 (!%p213_p10), %v758_v3  ;;  %666 = vset.pattern.permute.xlu0 (!%p213_p10), %v759_v4  ;;  %v875_v23 = vadd.s32 (!%p213_p10), 128, %v872_v21  ;;  %v283_v25 = vand.u32 (!%p213_p10), 15, %v872_v21  ;;  %vm297_vm0 = vcmp.lt.s32.totalorder (!%p213_p10), %v872_v21, 1  ;;  %vm306_vm3 = vcmp.lt.s32.totalorder (!%p213_p10), %v872_v21, 127 }
  0x15   : > { %377 = vperm.xlu1 (!%p213_p10), %668, %v311_v0   ;;  %350 = vperm.xlu0 (!%p213_p10), %666, %v311_v0   ;;  %vm369_vm6 = vcmp.lt.s32.totalorder (!%p213_p10), %v872_v21, 16  ;;  %vm289_vm7 = vcmp.ge.s32.totalorder (!%p213_p10), %v872_v21, 16  ;;  %vm402_vm8 = vcmp.lt.s32.totalorder (!%p213_p10), %v872_v21, 112 }
  0x16   : > { %s255_s5 = scalar_select %p254_p11, %s746_s18, 1  ;;  %v284_v26 = vand.u32 15, %v875_v23  ;;  %vm285_vm1 = vcmp.gt.s32.totalorder %v283_v25, 0  ;;  %vm287_vm4 = vcmp.lt.s32.totalorder %v283_v25, 15  ;;  %vm292_vm9 = vcmp.lt.s32.totalorder %v875_v23, 240 }
  0x17   : > { %s769_s18 = smov [#allocation2]  }
  0x18   : > { %s591_s6 = sshll.u32 %s255_s5, 2  ;;  %vm286_vm2 = vcmp.gt.s32.totalorder %v284_v26, 0  ;;  %vm288_vm5 = vcmp.lt.s32.totalorder %v284_v26, 15  ;;  %s253_s5 = scalar_lea.vmem [#allocation2], %s583_s29 }
  0x19   : > { %s262_s9 = scalar_lea.vmem %s943_s0, %s591_s6  ;;  %669 = vset.pattern.permute.xlu1 %v760_v7  ;;  %670 = vset.pattern.permute.xlu0 %v761_v8  ;;  %s451_s6 = sshll.u32 %s253_s5, 4  ;;  %s898_s6 = int_to_ptr.vmem [resolvable:$true] %s451_s6 }
  0x1a   : > { %v275_v5 = vld [vmem:[%s262_s9] sm:$0xf]  ;;  %383 = vperm.xlu1 %669, %v311_v0   ;;  %391 = vperm.xlu0 %670, %v311_v0   ;;  %s896_s9 = scalar_lea.hbm %s947_s4, %s592_s30  ;;  %s680_s12 = sshll.u32 %s769_s18, 4  ;;  %s681_s12 = int_to_ptr.vmem [resolvable:$false] %s680_s12 }
  0x1b   : > { %v276_v6 = vunpack.c.0.s8 %v275_v5  ;;  %v277_v10 = vunpack.c.1.s8 %v275_v5  ;;  %s682_s13 = scalar_lea.vmem %s681_s12, 128  ;;  %p683_p1 = scmp.lt.s32.totalorder %s898_s6, %s681_s12 }
  0x1d   : > { %v858_v9 = vcvt.s32.f32 %v276_v6  ;;  %v862_v11 = vcvt.s32.f32 %v277_v10 }
  0x1e   : > { %671 = vset.pattern.permute.xlu0 %v764_v12  ;;  %672 = vset.pattern.permute.xlu1 %v765_v13 }
  0x1f   : > { %293 = vrot.lane.b32.xlu1 %v858_v9, %s762_s10  ;;  %302 = vrot.lane.b32.xlu0 %v858_v9, %s763_s11 }
  0x23   : > { %295 = vrot.lane.b32.xlu1 %v862_v11, %s762_s10  ;;  %315 = vperm.xlu0 %671, %v311_v0   ;;  %s435_s10 = scalar_lea.sflag [#allocation3], %s251_s26 }
  0x27   : > { %304 = vrot.lane.b32.xlu1 %v862_v11, %s763_s11  ;;  %674 = vset.pattern.permute.xlu0 %v757_v2  ;;  %s676_s11 = scalar_lea.vmem %s898_s6, 64 }
  0x28   : > { %338 = vperm.xlu0 %674, %v312_v14   ;;  %p677_p12 = scmp.ne.s32.totalorder %s898_s6, %s676_s11  ;;  %p684_p2 = scmp.lt.s32.totalorder %s682_s13, %s676_s11 }
  0x2a   : > { %p678_p13 = pnand %p677_p12, %p835_p4  ;;  %p685_p3 = por %p684_p2, %p683_p1 }
  0x2b   : > { %321 = vperm.xlu1 %672, %v311_v0  }
  0x2c   : > { %p679_p0 = pneg %p678_p13 }
  0x2e   : > { %p686_p5 = pnand %p685_p3, %p679_p0 }
  0x2f   : > { %673 = vset.pattern.permute.xlu1 %v766_v15 }
  0x30   : > { %329 = vperm.xlu1 %673, %v311_v0  }
  0x34   : > { %675 = vset.pattern.permute.xlu1 %v757_v2 }
  0x35   : > { %412 = vperm.xlu1 %675, %v409_v16  }
  0x8f   : > { %v359_v17 = vpop.permute.xlu1 %358  ;;  %v345_v19 = vpop.permute.xlu0 %344 }
  0x94   : > { %v378_v20 = vpop.permute.xlu1 %377  ;;  %v351_v22 = vpop.permute.xlu0 %350 }
  0x95   : > { %v353_v38 = vmul.f32 %v351_v22, %v858_v9  ;;  %v354_v39 = vmul.f32 %v351_v22, %v862_v11 }
  0x99   : > { %v384_v24 = vpop.permute.xlu1 %383  ;;  %v392_v28 = vpop.permute.xlu0 %391 }
  0x9a   : > { %v386_v50 = vmul.f32 %v384_v24, %v858_v9  ;;  %v387_v51 = vmul.f32 %v384_v24, %v862_v11 }
  0x9d   : > { %v294_v27 = vpop.permute.xlu1 %293  ;;  %v303_v34 = vpop.permute.xlu0 %302 }
  0xa1   : > { %v296_v29 = vpop.permute.xlu1 %295 }
  0xa2   : > { %v298_v30 = vsel %vm297_vm0, %v294_v27, %v296_v29  ;;  %v299_v31 = vsel %vm297_vm0, %v296_v29, %v294_v27  ;;  %v316_v53 = vpop.permute.xlu0 %315 }
  0xa3   : > { %v300_v32 = vsel %vm285_vm1, %v299_v31, 0.0  ;;  %v301_v33 = vsel %vm286_vm2, %v298_v30, 0.0 }
  0xa4   : > { %v347_v35 = vmul.f32 %v345_v19, %v300_v32  ;;  %v348_v36 = vmul.f32 %v345_v19, %v301_v33  ;;  %v380_v42 = vmul.f32 %v378_v20, %v300_v32  ;;  %v381_v43 = vmul.f32 %v378_v20, %v301_v33 }
  0xa5   : > { %v305_v37 = vpop.permute.xlu1 %304  ;;  %v318_v62 = vmul.f32 %v316_v53, %v300_v32  ;;  %v319_v63 = vmul.f32 %v316_v53, %v301_v33 }
  0xa6   : > { %v307_v40 = vsel %vm306_vm3, %v303_v34, %v305_v37  ;;  %v308_v41 = vsel %vm306_vm3, %v305_v37, %v303_v34  ;;  %v356_v48 = vadd.f32 %v354_v39, %v348_v36  ;;  %v355_v49 = vadd.f32 %v353_v38, %v347_v35 }
  0xa7   : > { %v309_v44 = vsel %vm287_vm4, %v307_v40, 0.0  ;;  %v310_v45 = vsel %vm288_vm5, %v308_v41, 0.0  ;;  %v389_v60 = vadd.f32 %v387_v51, %v381_v43  ;;  %v388_v61 = vadd.f32 %v386_v50, %v380_v42  ;;  %v339_v10 = vpop.permute.xlu0 %338 }
  0xa8   : > { %v361_v46 = vmul.f32 %v359_v17, %v309_v44  ;;  %v362_v47 = vmul.f32 %v359_v17, %v310_v45  ;;  %v394_v54 = vmul.f32 %v392_v28, %v309_v44  ;;  %v395_v55 = vmul.f32 %v392_v28, %v310_v45 }
  0xaa   : > { %v322_v52 = vpop.permute.xlu1 %321  ;;  %v364_v56 = vadd.f32 %v362_v47, %v356_v48  ;;  %v363_v57 = vadd.f32 %v361_v46, %v355_v49  ;;  %v397_v1 = vadd.f32 %v395_v55, %v389_v60  ;;  %v396_v2 = vadd.f32 %v394_v54, %v388_v61 }
  0xab   : > { %v324_v58 = vmul.f32 %v322_v52, %v858_v9  ;;  %v325_v59 = vmul.f32 %v322_v52, %v862_v11 }
  0xac   : > { %367 = vrot.lane.b32.xlu0 %v364_v56, %s767_s22  ;;  %365 = vrot.lane.b32.xlu1 %v363_v57, %s767_s22 }
  0xad   : > { %v326_v3 = vadd.f32 %v324_v58, %v318_v62  ;;  %v327_v4 = vadd.f32 %v325_v59, %v319_v63 }
  0xaf   : > { %v330_v0 = vpop.permute.xlu1 %329 }
  0xb0   : > { %v332_v5 = vmul.f32 %v330_v0, %v309_v44  ;;  %v333_v6 = vmul.f32 %v330_v0, %v310_v45  ;;  %400 = vrot.lane.b32.xlu0 %v397_v1, %s768_s24  ;;  %398 = vrot.lane.b32.xlu1 %v396_v2, %s768_s24 }
  0xb2   : > { %v334_v7 = vadd.f32 %v332_v5, %v326_v3  ;;  %v335_v8 = vadd.f32 %v333_v6, %v327_v4 }
  0xb4   : > { %v413_v9 = vpop.permute.xlu1 %412  ;;  %v341_v13 = vadd.f32 %v339_v10, %v334_v7  ;;  %v342_v17 = vadd.f32 %v339_v10, %v335_v8 }
 0x11e   : > { %v368_v11 = vpop.permute.xlu0 %367  ;;  %v366_v12 = vpop.permute.xlu1 %365 }
 0x11f   : > { %v371_v14 = vsel %vm369_vm6, %v368_v11, %v366_v12  ;;  %v370_v15 = vsel %vm369_vm6, %v366_v12, %v368_v11 }
 0x120   : > { %v372_v16 = vsel %vm289_vm7, %v371_v14, 0.0  ;;  %v375_v22 = vadd.f32 %v370_v15, %v342_v17 }
 0x121   : > { %v374_v18 = vadd.f32 %v372_v16, %v341_v13 }
 0x122   : > { %v401_v19 = vpop.permute.xlu0 %400  ;;  %v399_v20 = vpop.permute.xlu1 %398 }
 0x123   : > { %v403_v24 = vsel %vm402_vm8, %v399_v20, %v401_v19  ;;  %v404_v25 = vsel %vm402_vm8, %v401_v19, %v399_v20 }
 0x124   : > { %v406_v26 = vsel %vm292_vm9, %v404_v25, 0.0  ;;  %v407_v27 = vadd.f32 %v403_v24, %v374_v18 }
 0x125   : > { %v408_v28 = vadd.f32 %v406_v26, %v375_v22 }
 0x126   : > { %v415_v29 = vmul.f32 %v413_v9, %v407_v27 }
 0x127   : > { %v416_v30 = vmul.f32 %v413_v9, %v408_v28 }
 0x128   : > { %v417_v31 = vadd.f32 128.0, %v415_v29 }
 0x129   : > { %v418_v32 = vadd.f32 128.0, %v416_v30 }
 0x12a   : > { %v593_v33 = vtrunc.f32 %v417_v31 }
 0x12b   : > { %v595_v21 = vtrunc.f32 %v418_v32 }
 0x12c   : > { %v594_v34 = vcvt.f32.s32 %v593_v33 }
 0x12d   : > { %v596_v35 = vcvt.f32.s32 %v595_v21 }
 0x12e   : > { %v421_v36 = vshra.s32 %v594_v34, 8 }
 0x12f   : > { %v422_v23 = vshra.s32 %v596_v35, 8 }
 0x130   : > { %vm423_vm10 = vcmp.gt.s32.totalorder %v421_v36, 0 }
 0x131   : > { %v424_v37 = vsel %vm423_vm10, %v421_v36, 0  ;;  %vm425_vm11 = vcmp.gt.s32.totalorder %v422_v23, 0 }
 0x132   : > { %v426_v38 = vsel %vm425_vm11, %v422_v23, 0  ;;  %vm427_vm12 = vcmp.lt.s32.totalorder %v424_v37, 127 }
 0x133   : > { %v428_v39 = vsel %vm427_vm12, %v424_v37, 127  ;;  %vm429_vm13 = vcmp.lt.s32.totalorder %v426_v38, 127 }
 0x134   : > { %v430_v40 = vsel %vm429_vm13, %v426_v38, 127 }
 0x135   : > { %v431_v41 = vpack.c.b16 %v430_v40, %v428_v39 }
 0x137   : > { %v432_v42 = vpack.c.b8 %v431_v41, %v431_v41 }
 0x139   : > { %433 = vst [vmem:[%s253_s5] sm:$0xf] %v432_v42 }
 0x13a   : > { %689 = shalt.err (!%p686_p5)
}
 0x13b   : > { %s690_s14 = scalar_lea.hbm %s896_s9, 64  ;;  %s694_s24 = scalar_lea.hbm %s947_s4, 128 }
 0x13c   : > { %p691_p6 = scmp.ne.s32.totalorder %s896_s9, %s690_s14  ;;  %p695_p10 = scmp.lt.u32.totalorder %s896_s9, %s947_s4 }
 0x13d   : > { %p696_p11 = scmp.lt.u32.totalorder %s694_s24, %s690_s14  ;;  %p698_p13 = scmp.lt.u32.totalorder %s690_s14, %s896_s9 }
 0x13e   : > { %p692_p7 = pnand %p691_p6, %p835_p4 }
 0x13f   : > { %p697_p12 = por %p696_p11, %p695_p10 }
 0x140   : > { %p693_p9 = pneg %p692_p7 }
 0x141   : > { %p699_p0 = por %p698_p13, %p697_p12 }
 0x143   : > { %p700_p1 = pnand %p699_p0, %p693_p9 }
 0x145   : > { %703 = shalt.err (!%p700_p1)
}
 0x146   : > { %597 = dma.vmem_to_hbm [thread:$0]  (%p835_p4), %s898_s6, 64, %s896_s9, %s435_s10  }
 0x147 PF: > { %p603_p2 = scmp.ge.s32.totalorder %s754_s20, 2  ;;  %s463_s30 = sand.u32 1, %s734_s15  }
 0x148   : > { %s464_s5 = scalar_lea.sflag [#allocation3], %s463_s30 }
 0x149   : > { %p600_p3 = pnand %p603_p2, %p842_p8 }
 0x14b   : > { %729 = dma.done.wait (!%p600_p3), %s464_s5, 64  }
 0x14c   : > { %731 = vsyncadd (!%p600_p3), %s464_s5, 4294967232  ;;  %s17_s20 = sadd.s32 1, %s754_s20   ;;  %s950_s15 = smov %s738_s16 }
 0x14d   : > { %p14_p5 = scmp.ge.s32.totalorder %s17_s20, 4   ;;  %s951_s16 = smov %s742_s17 }
 0x14e   : > { %s952_s17 = smov %s848_s28  ;;  %s953_s18 = smov %s750_s19 }
 0x14f   : > { %s954_s19 = smov %s956_s23  ;;  %16 = sbr.rel (!%p14_p5) target bundleno = 4 (0x4), region = 80 }
 0x156   :  { %469 = vsyncpa [#allocation3], 1 }
 0x157   :  { %471 = vsyncpa [#allocation3 + $0x1], 1 }

</bundles_post_ra>
